<compile_context>
chip_gen: v7x
topology: tpu7x:2x2x1
jax: 0.10.0
libtpu: 0.0.40
codegen_flags: <defaults>
</compile_context>

<pallas_src>
import functools

import jax
import jax.numpy as jnp
from jax.experimental import pallas as pl
from jax.experimental.pallas import tpu as pltpu


def conv1d_relu_kernel(x_ref, w_ref, b_ref, o_ref, *, k, T):
    """Fused pad-conv1d-bias-relu for one batch element.

    x_ref : (1, T + k - 1, C_in)   zero-padded input (time-major, channels last)
    w_ref : (k, C_in, C_out)       per-tap weight matrices (pre-transposed)
    b_ref : (1, C_out)             bias
    o_ref : (1, T, C_out)          output
    """
    x = x_ref[0].astype(jnp.float32)                      # (T + k - 1, C_in)
    c_out = o_ref.shape[2]

    acc = jnp.zeros((T, c_out), jnp.float32)
    # Static unrolled loop over the k taps: each tap is one MXU matmul
    # (T, C_in) @ (C_in, C_out) accumulated in f32.
    for j in range(k):
        acc = acc + jnp.dot(
            x[j:j + T, :],
            w_ref[j].astype(jnp.float32),
            preferred_element_type=jnp.float32,
        )

    acc = acc + b_ref[...].astype(jnp.float32)            # (1, C_out) broadcast
    o_ref[0] = jnp.maximum(acc, 0.0).astype(o_ref.dtype)  # fused ReLU


@jax.jit
def conv_layer_forward(x, weight, bias):
    """Mirrors ConvLayer.forward.

    x      : (B, T, C)           batch, window_size, n_features
    weight : (C_out, C_in, k)    PyTorch Conv1d weight layout
    bias   : (C_out,)
    returns: (B, T, C_out)
    """
    B, T, C_in = x.shape
    C_out, C_in_w, k = weight.shape
    assert C_in == C_in_w
    p = (k - 1) // 2

    # ConstantPad1d((k-1)//2, 0.0): zero-pad the time axis on both sides.
    x_pad = jnp.pad(x, ((0, 0), (p, p), (0, 0)))          # (B, T + 2p, C_in)
    T_pad = T + 2 * p

    # Pre-transpose weights to per-tap (C_in, C_out) matrices for the MXU.
    w_taps = jnp.transpose(weight, (2, 1, 0))             # (k, C_in, C_out)
    b2 = bias.reshape(1, C_out)

    kernel = functools.partial(conv1d_relu_kernel, k=k, T=T)

    return pl.pallas_call(
        kernel,
        out_shape=jax.ShapeDtypeStruct((B, T, C_out), x.dtype),
        grid_spec=pltpu.PrefetchScalarGridSpec(
            num_scalar_prefetch=0,
            grid=(B,),
            in_specs=[
                # One full padded sequence per grid step; last two dims equal
                # the full array dims, so no (8,128) tiling constraint issues.
                pl.BlockSpec((1, T_pad, C_in), lambda b: (b, 0, 0)),
                # Weights / bias are replicated across the batch grid.
                pl.BlockSpec((k, C_in, C_out), lambda b: (0, 0, 0)),
                pl.BlockSpec((1, C_out), lambda b: (0, 0)),
            ],
            out_specs=pl.BlockSpec((1, T, C_out), lambda b: (b, 0, 0)),
        ),
        compiler_params=pltpu.CompilerParams(
            # Batch elements are independent -> parallel (megacore on v7x).
            dimension_semantics=("parallel",),
        ),
    )(x_pad, w_taps, b2)


def conv_layer_reference(x, weight, bias):
    """Pure-JAX reference matching the PyTorch ConvLayer (eval forward)."""
    k = weight.shape[-1]
    p = (k - 1) // 2
    xc = jnp.transpose(x, (0, 2, 1))                      # (B, C, T)
    xc = jnp.pad(xc, ((0, 0), (0, 0), (p, p)))            # ConstantPad1d
    y = jax.lax.conv_general_dilated(
        xc, weight, window_strides=(1,), padding="VALID",
        dimension_numbers=("NCH", "OIH", "NCH"),
    )
    y = y + bias[None, :, None]
    y = jnp.maximum(y, 0.0)                               # ReLU
    return jnp.transpose(y, (0, 2, 1))                    # (B, T, C)


if __name__ == "__main__":
    # ConvLayer(n_features=32, kernel_size=7), window_size=16, batch=2.
    B, T, C, K = 2, 16, 32, 7

    key = jax.random.PRNGKey(0)
    kx, kw, kb = jax.random.split(key, 3)

    x = jax.random.normal(kx, (B, T, C), jnp.float32)
    # PyTorch Conv1d default init: U(-1/sqrt(fan_in), 1/sqrt(fan_in)).
    bound = 1.0 / jnp.sqrt(jnp.float32(C * K))
    weight = jax.random.uniform(kw, (C, C, K), jnp.float32, -bound, bound)
    bias = jax.random.uniform(kb, (C,), jnp.float32, -bound, bound)

    out = conv_layer_forward(x, weight, bias)
    out = jax.block_until_ready(out)

    out_ref = conv_layer_reference(x, weight, bias)
    assert out.shape == (B, T, C)
    assert jnp.allclose(out, out_ref, atol=1e-4, rtol=1e-5), (
        float(jnp.max(jnp.abs(out - out_ref)))
    )

    print("KERNEL_OK")
</pallas_src>

<mosaic_0001>
module attributes {stable_mosaic.version = 11 : i64} {
  func.func @conv1d_relu_kernel(%arg0: i32, %arg1: memref<1x22x32xf32, #tpu.memory_space<vmem>>, %arg2: memref<7x32x32xf32, #tpu.memory_space<vmem>>, %arg3: memref<1x32xf32, #tpu.memory_space<vmem>>, %arg4: memref<1x16x32xf32, #tpu.memory_space<vmem>>) attributes {dimension_semantics = [#tpu.dimension_semantics<parallel>], iteration_bounds = array<i64: 2>, scalar_prefetch = 0 : i64, scratch_operands = 0 : i64, tpu.core_type = #tpu.core_type<tc>, window_params = [{transform_indices = @transform_0, window_bounds = array<i64: 1, 22, 32>}, {pipeline_mode = #tpu.pipeline_mode<synchronous>, transform_indices = @transform_1, window_bounds = array<i64: 7, 32, 32>}, {pipeline_mode = #tpu.pipeline_mode<synchronous>, transform_indices = @transform_2, window_bounds = array<i64: 1, 32>}, {transform_indices = @transform_3, window_bounds = array<i64: 1, 16, 32>}]} {
    %c0 = arith.constant 0 : index
    %c0_0 = arith.constant 0 : index
    %c0_1 = arith.constant 0 : index
    %0 = vector.load %arg1[%c0, %c0_0, %c0_1] : memref<1x22x32xf32, #tpu.memory_space<vmem>>, vector<1x22x32xf32>
    %1 = vector.shape_cast %0 : vector<1x22x32xf32> to vector<22x32xf32>
    %cst = arith.constant 0.000000e+00 : f32
    %2 = vector.broadcast %cst : f32 to vector<16x32xf32>
    %3 = vector.extract_strided_slice %1 {offsets = [0, 0], sizes = [16, 32], strides = [1, 1]} : vector<22x32xf32> to vector<16x32xf32>
    %c0_2 = arith.constant 0 : index
    %c0_3 = arith.constant 0 : index
    %c0_4 = arith.constant 0 : index
    %4 = vector.load %arg2[%c0_2, %c0_3, %c0_4] : memref<7x32x32xf32, #tpu.memory_space<vmem>>, vector<1x32x32xf32>
    %5 = vector.shape_cast %4 : vector<1x32x32xf32> to vector<32x32xf32>
    %cst_5 = arith.constant dense<0.000000e+00> : vector<16x32xf32>
    %6 = tpu.matmul %3, %5, %cst_5 {dimension_numbers = #tpu.dot_dimension_numbers<[1], [0], [0], [1], [0, 0, 1, 1], [], []>} : vector<16x32xf32>, vector<32x32xf32>, vector<16x32xf32> -> vector<16x32xf32>
    %7 = arith.addf %2, %6 : vector<16x32xf32>
    %8 = vector.extract_strided_slice %1 {offsets = [1, 0], sizes = [16, 32], strides = [1, 1]} : vector<22x32xf32> to vector<16x32xf32>
    %c1 = arith.constant 1 : index
    %c0_6 = arith.constant 0 : index
    %c0_7 = arith.constant 0 : index
    %9 = vector.load %arg2[%c1, %c0_6, %c0_7] : memref<7x32x32xf32, #tpu.memory_space<vmem>>, vector<1x32x32xf32>
    %10 = vector.shape_cast %9 : vector<1x32x32xf32> to vector<32x32xf32>
    %cst_8 = arith.constant dense<0.000000e+00> : vector<16x32xf32>
    %11 = tpu.matmul %8, %10, %cst_8 {dimension_numbers = #tpu.dot_dimension_numbers<[1], [0], [0], [1], [0, 0, 1, 1], [], []>} : vector<16x32xf32>, vector<32x32xf32>, vector<16x32xf32> -> vector<16x32xf32>
    %12 = arith.addf %7, %11 : vector<16x32xf32>
    %13 = vector.extract_strided_slice %1 {offsets = [2, 0], sizes = [16, 32], strides = [1, 1]} : vector<22x32xf32> to vector<16x32xf32>
    %c2 = arith.constant 2 : index
    %c0_9 = arith.constant 0 : index
    %c0_10 = arith.constant 0 : index
    %14 = vector.load %arg2[%c2, %c0_9, %c0_10] : memref<7x32x32xf32, #tpu.memory_space<vmem>>, vector<1x32x32xf32>
    %15 = vector.shape_cast %14 : vector<1x32x32xf32> to vector<32x32xf32>
    %cst_11 = arith.constant dense<0.000000e+00> : vector<16x32xf32>
    %16 = tpu.matmul %13, %15, %cst_11 {dimension_numbers = #tpu.dot_dimension_numbers<[1], [0], [0], [1], [0, 0, 1, 1], [], []>} : vector<16x32xf32>, vector<32x32xf32>, vector<16x32xf32> -> vector<16x32xf32>
    %17 = arith.addf %12, %16 : vector<16x32xf32>
    %18 = vector.extract_strided_slice %1 {offsets = [3, 0], sizes = [16, 32], strides = [1, 1]} : vector<22x32xf32> to vector<16x32xf32>
    %c3 = arith.constant 3 : index
    %c0_12 = arith.constant 0 : index
    %c0_13 = arith.constant 0 : index
    %19 = vector.load %arg2[%c3, %c0_12, %c0_13] : memref<7x32x32xf32, #tpu.memory_space<vmem>>, vector<1x32x32xf32>
    %20 = vector.shape_cast %19 : vector<1x32x32xf32> to vector<32x32xf32>
    %cst_14 = arith.constant dense<0.000000e+00> : vector<16x32xf32>
    %21 = tpu.matmul %18, %20, %cst_14 {dimension_numbers = #tpu.dot_dimension_numbers<[1], [0], [0], [1], [0, 0, 1, 1], [], []>} : vector<16x32xf32>, vector<32x32xf32>, vector<16x32xf32> -> vector<16x32xf32>
    %22 = arith.addf %17, %21 : vector<16x32xf32>
    %23 = vector.extract_strided_slice %1 {offsets = [4, 0], sizes = [16, 32], strides = [1, 1]} : vector<22x32xf32> to vector<16x32xf32>
    %c4 = arith.constant 4 : index
    %c0_15 = arith.constant 0 : index
    %c0_16 = arith.constant 0 : index
    %24 = vector.load %arg2[%c4, %c0_15, %c0_16] : memref<7x32x32xf32, #tpu.memory_space<vmem>>, vector<1x32x32xf32>
    %25 = vector.shape_cast %24 : vector<1x32x32xf32> to vector<32x32xf32>
    %cst_17 = arith.constant dense<0.000000e+00> : vector<16x32xf32>
    %26 = tpu.matmul %23, %25, %cst_17 {dimension_numbers = #tpu.dot_dimension_numbers<[1], [0], [0], [1], [0, 0, 1, 1], [], []>} : vector<16x32xf32>, vector<32x32xf32>, vector<16x32xf32> -> vector<16x32xf32>
    %27 = arith.addf %22, %26 : vector<16x32xf32>
    %28 = vector.extract_strided_slice %1 {offsets = [5, 0], sizes = [16, 32], strides = [1, 1]} : vector<22x32xf32> to vector<16x32xf32>
    %c5 = arith.constant 5 : index
    %c0_18 = arith.constant 0 : index
    %c0_19 = arith.constant 0 : index
    %29 = vector.load %arg2[%c5, %c0_18, %c0_19] : memref<7x32x32xf32, #tpu.memory_space<vmem>>, vector<1x32x32xf32>
    %30 = vector.shape_cast %29 : vector<1x32x32xf32> to vector<32x32xf32>
    %cst_20 = arith.constant dense<0.000000e+00> : vector<16x32xf32>
    %31 = tpu.matmul %28, %30, %cst_20 {dimension_numbers = #tpu.dot_dimension_numbers<[1], [0], [0], [1], [0, 0, 1, 1], [], []>} : vector<16x32xf32>, vector<32x32xf32>, vector<16x32xf32> -> vector<16x32xf32>
    %32 = arith.addf %27, %31 : vector<16x32xf32>
    %33 = vector.extract_strided_slice %1 {offsets = [6, 0], sizes = [16, 32], strides = [1, 1]} : vector<22x32xf32> to vector<16x32xf32>
    %c6 = arith.constant 6 : index
    %c0_21 = arith.constant 0 : index
    %c0_22 = arith.constant 0 : index
    %34 = vector.load %arg2[%c6, %c0_21, %c0_22] : memref<7x32x32xf32, #tpu.memory_space<vmem>>, vector<1x32x32xf32>
    %35 = vector.shape_cast %34 : vector<1x32x32xf32> to vector<32x32xf32>
    %cst_23 = arith.constant dense<0.000000e+00> : vector<16x32xf32>
    %36 = tpu.matmul %33, %35, %cst_23 {dimension_numbers = #tpu.dot_dimension_numbers<[1], [0], [0], [1], [0, 0, 1, 1], [], []>} : vector<16x32xf32>, vector<32x32xf32>, vector<16x32xf32> -> vector<16x32xf32>
    %37 = arith.addf %32, %36 : vector<16x32xf32>
    %c0_24 = arith.constant 0 : index
    %c0_25 = arith.constant 0 : index
    %38 = vector.load %arg3[%c0_24, %c0_25] : memref<1x32xf32, #tpu.memory_space<vmem>>, vector<1x32xf32>
    %39 = vector.broadcast %38 : vector<1x32xf32> to vector<16x32xf32>
    %40 = arith.addf %37, %39 : vector<16x32xf32>
    %cst_26 = arith.constant 0.000000e+00 : f32
    %41 = vector.broadcast %cst_26 : f32 to vector<16x32xf32>
    %42 = arith.maximumf %40, %41 : vector<16x32xf32>
    %c0_27 = arith.constant 0 : index
    %c0_28 = arith.constant 0 : index
    %c0_29 = arith.constant 0 : index
    %43 = vector.load %arg4[%c0_27, %c0_28, %c0_29] : memref<1x16x32xf32, #tpu.memory_space<vmem>>, vector<1x16x32xf32>
    %44 = vector.shape_cast %43 : vector<1x16x32xf32> to vector<16x32xf32>
    %45 = vector.shape_cast %42 : vector<16x32xf32> to vector<1x16x32xf32>
    tpu.vector_store %arg4[%c0_27, %c0_28, %c0_29], %45 {strides = array<i32>} : memref<1x16x32xf32, #tpu.memory_space<vmem>>, vector<1x16x32xf32>,
    return
  }
  func.func @transform_0(%arg0: i32) -> (i32, i32, i32) {
    %c0_i32 = arith.constant 0 : i32
    %c0_i32_0 = arith.constant 0 : i32
    %c0_i32_1 = arith.constant 0 : i32
    return %arg0, %c0_i32, %c0_i32_0 : i32, i32, i32
  }
  func.func @transform_1(%arg0: i32) -> (i32, i32, i32) {
    %c0_i32 = arith.constant 0 : i32
    %c0_i32_0 = arith.constant 0 : i32
    %c0_i32_1 = arith.constant 0 : i32
    %c0_i32_2 = arith.constant 0 : i32
    return %c0_i32, %c0_i32_0, %c0_i32_1 : i32, i32, i32
  }
  func.func @transform_2(%arg0: i32) -> (i32, i32) {
    %c0_i32 = arith.constant 0 : i32
    %c0_i32_0 = arith.constant 0 : i32
    %c0_i32_1 = arith.constant 0 : i32
    return %c0_i32, %c0_i32_0 : i32, i32
  }
  func.func @transform_3(%arg0: i32) -> (i32, i32, i32) {
    %c0_i32 = arith.constant 0 : i32
    %c0_i32_0 = arith.constant 0 : i32
    %c0_i32_1 = arith.constant 0 : i32
    return %arg0, %c0_i32, %c0_i32_0 : i32, i32, i32
  }
}

</mosaic_0001>

<bundles_post_ra>
// kernel: conv_layer_forward.1
= control target key start
LH: loop header
LB: loop body
LE: loop exit
PB: predicated region body
PF: predicated region fallthrough
CT: control target
= control target key end

     0   :  { %8 = vsyncpa [#allocation3], 0  ;;  %s1507_s0 = inlined_call_operand.vmem [shape: f32[2,22,32], index: 0, kind: input, shape index: {}]   ;;  %s1508_s1 = inlined_call_operand.vmem [shape: f32[7,32,32], index: 1, kind: input, shape index: {}]   ;;  %s1509_s2 = inlined_call_operand.vmem [shape: f32[1,32], index: 2, kind: input, shape index: {}]   ;;  %s1510_s3 = inlined_call_operand.hbm [shape: f32[2,16,32], index: 3, kind: output, shape index: {}]  }
   0x1   :  { %10 = vsyncpa [#allocation3 + $0x1], 0  ;;  %s1265_s12 = smov 0   ;;  %s1267_s13 = smov 0  }
   0x2   :  { %s1269_s14 = smov 0   ;;  %s1271_s15 = smov 0  }
   0x3 LB: > { %s1286_s16 = sadd.s32 4294967295, %s1240_s15   ;;  %s898_s17 = sadd.s32 4294967294, %s1240_s15   ;;  %s1240_s15 = sphi %s1271_s15, %s1516_s15   ;;  %s1236_s14 = sphi %s1269_s14, %s1515_s14   ;;  %s1232_s13 = sphi %s1267_s13, %s1514_s13   ;;  %s1228_s12 = sphi %s1265_s12, %s1513_s12  }
   0x4   : > { %s1290_s18 = sadd.s32 1, %s1240_s15   ;;  %s91_s19 = sadd.s32 1, %s1236_s14 }
   0x5   : > { %s88_s20 = ssub.s32 %s1240_s15, %s1290_s18  ;;  %p101_p0 = scmp.ne.s32.totalorder %s1236_s14, %s1232_s13 }
   0x6   : > { %p89_p1 = scmp.eq.s32.totalorder %s88_s20, 0  ;;  %p102_p2 = scmp.eq.s32.totalorder %s1286_s16, 1 }
   0x7   : > { %p107_p3 = scmp.ne.s32.totalorder %s1232_s13, %s1228_s12  ;;  %p108_p4 = scmp.eq.s32.totalorder %s898_s17, 1 }
   0x8   : > { %s1301_s21 = scalar_select %p89_p1, %s1236_s14, %s91_s19  }
   0x9   : > { %p1303_p5 = por %p102_p2, %p101_p0  ;;  %p1307_p6 = por %p108_p4, %p107_p3 }
   0xa   : > { %p901_p7 = scmp.ge.s32.totalorder %s1240_s15, 1  ;;  %p140_p8 = scmp.lt.s32.totalorder %s1240_s15, 3 }
   0xc   : > { %p141_p9 = pnand %p901_p7, %p140_p8 }
   0xd   : > { %v918_v0 = vld [vmem:[%s1508_s1 + $0x60] sm:$0xff] (!%p141_p9)  ;;  %v919_v1 = vld [vmem:[%s1508_s1 + $0x68] sm:$0xff] (!%p141_p9)  ;;  %p164_p10 = scmp.lt.s32.totalorder (!%p141_p9), %s1286_s16, 1  ;;  %v920_v5 = vld [vmem:[%s1508_s1 + $0x70] sm:$0xff] (!%p141_p9)  ;;  %vm184_vm0 = vcmask (!%p141_p9), 1046528   ;;  %vm190_vm1 = vcmask (!%p141_p9), 261120  }
   0xe   : > { %144 = sbr.rel (%p141_p9) target bundleno = 289 (0x121), region = 32  ;;  %v904_v2 = vld [vmem:[%s1508_s1 + $0x20] sm:$0xff] (!%p141_p9)  ;;  %v1092_v3 = vpack.c.bf16 (!%p141_p9), %v919_v1, %v918_v0  ;;  %v905_v4 = vld [vmem:[%s1508_s1 + $0x28] sm:$0xff] (!%p141_p9)  ;;  %v921_v6 = vld [vmem:[%s1508_s1 + $0x78] sm:$0xff] (!%p141_p9)  ;;  %vm446_vm2 = vcmask (!%p141_p9), 1044480   ;;  %vm538_vm3 = vcmask (!%p141_p9), 1043456  }
   0xf   : > { %v1068_v7 = vpack.c.bf16 (!%p141_p9), %v905_v4, %v904_v2  ;;  %v1096_v8 = vpack.c.bf16 (!%p141_p9), %v921_v6, %v920_v5  ;;  %v906_v9 = vld [vmem:[%s1508_s1 + $0x30] sm:$0xff] (!%p141_p9)  ;;  %v907_v10 = vld [vmem:[%s1508_s1 + $0x38] sm:$0xff] (!%p141_p9)  ;;  %v924_v11 = vld [vmem:[%s1508_s1 + $0x80] sm:$0xff] (!%p141_p9)  ;;  %vm354_vm4 = vcmask (!%p141_p9), 1045504   ;;  %vm630_vm5 = vcmask (!%p141_p9), 1042432   ;;  %s948_s8 = sshll.u32 (!%p141_p9), %s1286_s16, 8 }
  0x10   : > { %1093 = vmatprep.subr.bf16.mxu0 (!%p141_p9), %v1092_v3  ;;  %v1072_v12 = vpack.c.bf16 (!%p141_p9), %v907_v10, %v906_v9  ;;  %v925_v13 = vld [vmem:[%s1508_s1 + $0x88] sm:$0xff] (!%p141_p9)  ;;  %v172_v14 = vld [vmem:[%s1508_s1] sm:$0xff] (!%p141_p9)  ;;  %v926_v17 = vld [vmem:[%s1508_s1 + $0x90] sm:$0xff] (!%p141_p9)  ;;  %vm722_vm6 = vcmask (!%p141_p9), 1041408   ;;  %s1242_s24 = smov (!%p141_p9), [#allocation2]  }
  0x11   : > { %v173_v15 = vld [vmem:[%s1508_s1 + $0x8] sm:$0xff] (!%p141_p9)  ;;  %1069 = vmatprep.subr.bf16.mxu1 (!%p141_p9), %v1068_v7  ;;  %1095 = vmatpush3.bf16.msra.mxu0 (!%p141_p9), %v1092_v3  ;;  %v1100_v16 = vpack.c.bf16 (!%p141_p9), %v925_v13, %v924_v11  ;;  %v927_v19 = vld [vmem:[%s1508_s1 + $0x98] sm:$0xff] (!%p141_p9)  ;;  %v174_v20 = vld [vmem:[%s1508_s1 + $0x10] sm:$0xff] (!%p141_p9)  ;;  %s1182_s25 = sshll.u32 (!%p141_p9), %s1242_s24, 4  ;;  %s1183_s25 = int_to_ptr.vmem [resolvable:$false] %s1182_s25 }
  0x12   : > { %1071 = vmatpush3.bf16.msra.mxu1 (!%p141_p9), %v1068_v7  ;;  %1097 = vmatprep.subr.bf16.mxu0 (!%p141_p9), %v1096_v8  ;;  %v1076_v18 = vpack.c.bf16 (!%p141_p9), %v173_v15, %v172_v14  ;;  %v175_v21 = vld [vmem:[%s1508_s1 + $0x18] sm:$0xff] (!%p141_p9)  ;;  %v1104_v35 = vpack.c.bf16 (!%p141_p9), %v927_v19, %v926_v17  ;;  %v930_v37 = vld [vmem:[%s1508_s1 + $0xa0] sm:$0xff] (!%p141_p9)  ;;  %v931_v40 = vld [vmem:[%s1508_s1 + $0xa8] sm:$0xff] (!%p141_p9)  ;;  %s1184_s26 = scalar_lea.vmem (!%p141_p9), %s1183_s25, 512 }
  0x13   : > { %1073 = vmatprep.subr.bf16.mxu1 (!%p141_p9), %v1072_v12  ;;  %v1080_v36 = vpack.c.bf16 (!%p141_p9), %v175_v21, %v174_v20  ;;  %v912_v41 = vld [vmem:[%s1508_s1 + $0x40] sm:$0xff] (!%p141_p9)  ;;  %v913_v42 = vld [vmem:[%s1508_s1 + $0x48] sm:$0xff] (!%p141_p9)  ;;  %v1108_v45 = vpack.c.bf16 (!%p141_p9), %v931_v40, %v930_v37  ;;  %v932_v47 = vld [vmem:[%s1508_s1 + $0xb0] sm:$0xff] (!%p141_p9) }
  0x14   : > { %v1084_v46 = vpack.c.bf16 (!%p141_p9), %v913_v42, %v912_v41  ;;  %v933_v48 = vld [vmem:[%s1508_s1 + $0xb8] sm:$0xff] (!%p141_p9)  ;;  %v914_v49 = vld [vmem:[%s1508_s1 + $0x50] sm:$0xff] (!%p141_p9)  ;;  %v936_v58 = vld [vmem:[%s1508_s1 + $0xc0] sm:$0xff] (!%p141_p9) }
  0x15   : > { %s165_s19 = scalar_select %p164_p10, %s1286_s16, 1  ;;  %1099 = vmatpush3.bf16.msra.mxu0 %v1096_v8  ;;  %v915_v50 = vld [vmem:[%s1508_s1 + $0x58] sm:$0xff]  ;;  %v1112_v56 = vpack.c.bf16 %v933_v48, %v932_v47  ;;  %v937_v59 = vld [vmem:[%s1508_s1 + $0xc8] sm:$0xff]  ;;  %v938_v3 = vld [vmem:[%s1508_s1 + $0xd0] sm:$0xff] }
  0x16   : > { %1075 = vmatpush3.bf16.msra.mxu1 %v1072_v12  ;;  %1101 = vmatprep.subr.bf16.mxu0 %v1100_v16  ;;  %v1088_v57 = vpack.c.bf16 %v915_v50, %v914_v49  ;;  %v1116_v0 = vpack.c.bf16 %v937_v59, %v936_v58  ;;  %v939_v4 = vld [vmem:[%s1508_s1 + $0xd8] sm:$0xff]  ;;  %v942_v14 = vld [vmem:[%s1509_s2] ss:$0 sm:$0xff] }
  0x17   : > { %s1136_s4 = smul.u32 24, %s165_s19  ;;  %1077 = vmatprep.subr.bf16.mxu1 %v1076_v18  ;;  %v1120_v7 = vpack.c.bf16 %v939_v4, %v938_v3  ;;  %s1460_s19 = scalar_lea.hbm %s1510_s3, %s948_s8 }
  0x19   : > { %s168_s9 = scalar_lea.vmem %s1507_s0, %s1136_s4  ;;  %s161_s4 = sand.u32 1, %s1232_s13  }
  0x1a   : > { %v1366_v22 = vld [vmem:[%s168_s9] sm:$0xff]  ;;  %v1368_v23 = vld [vmem:[%s168_s9 + $0x8] sm:$0xff]  ;;  %v1370_v24 = vld [vmem:[%s168_s9 + $0x10] sm:$0x3f]  ;;  %s902_s5 = sshll.u32 %s161_s4, 4  ;;  %s1466_s16 = scalar_lea.sflag [#allocation3], %s161_s4 }
  0x1b   : > { %v185_v25 = vrot.slane %v1366_v22, 1  ;;  %v186_v26 = vrot.slane %v1368_v23, 1  ;;  %v447_v27 = vrot.slane %v1366_v22, 3  ;;  %v448_v28 = vrot.slane %v1368_v23, 3  ;;  %s163_s9 = scalar_lea.vmem [#allocation2], %s902_s5 }
  0x1c   : > { %v188_v29 = vrot.slane %v1370_v24, 1  ;;  %v450_v30 = vrot.slane %v1370_v24, 3  ;;  %v539_v31 = vrot.slane %v1366_v22, 4  ;;  %v540_v32 = vrot.slane %v1368_v23, 4  ;;  %s836_s10 = sshll.u32 %s163_s9, 4  ;;  %s1462_s10 = int_to_ptr.vmem [resolvable:$true] %s836_s10 }
  0x1d   : > { %v187_v33 = vsel %vm184_vm0, %v185_v25, %v186_v26  ;;  %v449_v34 = vsel %vm446_vm2, %v447_v27, %v448_v28  ;;  %v542_v44 = vrot.slane %v1370_v24, 4  ;;  %v355_v51 = vrot.slane %v1366_v22, 2  ;;  %s1178_s20 = scalar_lea.vmem %s1462_s10, 256  ;;  %p1185_p0 = scmp.lt.s32.totalorder %s1462_s10, %s1183_s25 }
  0x1e   : > { %999 = vmatprep.mubr.msk.f32.mxu1 %vm190_vm1, %v187_v33  ;;  %1032 = vmatprep.mubr.msk.f32.mxu0 %vm190_vm1, %v449_v34  ;;  %v189_v38 = vsel %vm184_vm0, %v186_v26, %v188_v29  ;;  %v451_v39 = vsel %vm446_vm2, %v448_v28, %v450_v30  ;;  %v541_v43 = vsel %vm538_vm3, %v539_v31, %v540_v32  ;;  %v356_v52 = vrot.slane %v1368_v23, 2  ;;  %p1179_p11 = scmp.ne.s32.totalorder %s1462_s10, %s1178_s20  ;;  %p1186_p1 = scmp.lt.s32.totalorder %s1184_s26, %s1178_s20 }
  0x1f   : > { %1000 = vmatmul.mubr.msk.f32.vlgmr.msra.gmra.mrb[0].mxu1 %vm190_vm1, %v189_v38  ;;  %1033 = vmatmul.mubr.msk.f32.vlgmr.msra.gmra.mrb[0].mxu0 %vm190_vm1, %v451_v39  ;;  %v631_v53 = vrot.slane %v1366_v22, 5  ;;  %v632_v54 = vrot.slane %v1368_v23, 5  ;;  %v543_v55 = vsel %vm538_vm3, %v540_v32, %v542_v44  ;;  %v358_v62 = vrot.slane %v1370_v24, 2 }
  0x20   : > { %1103 = vmatpush3.bf16.msra.mxu0 %v1100_v16  ;;  %1079 = vmatpush3.bf16.msra.mxu1 %v1076_v18  ;;  %v357_v60 = vsel %vm354_vm4, %v355_v51, %v356_v52  ;;  %v634_v63 = vrot.slane %v1370_v24, 5  ;;  %v723_v1 = vrot.slane %v1366_v22, 6  ;;  %v724_v2 = vrot.slane %v1368_v23, 6  ;;  %p1180_p12 = pnand %p1179_p11, %p1303_p5  ;;  %p1187_p2 = por %p1186_p1, %p1185_p0 }
  0x21   : > { %1105 = vmatprep.subr.bf16.mxu0 %v1104_v35  ;;  %1081 = vmatprep.subr.bf16.mxu1 %v1080_v36  ;;  %v633_v61 = vsel %vm630_vm5, %v631_v53, %v632_v54  ;;  %v359_v5 = vsel %vm354_vm4, %v356_v52, %v358_v62  ;;  %v726_v9 = vrot.slane %v1370_v24, 6 }
  0x22   : > { %1010 = vmatprep.mubr.msk.f32.mxu1 %vm190_vm1, %v1366_v22  ;;  %1043 = vmatprep.mubr.msk.f32.mxu0 %vm190_vm1, %v541_v43  ;;  %v635_v6 = vsel %vm630_vm5, %v632_v54, %v634_v63  ;;  %v725_v8 = vsel %vm722_vm6, %v723_v1, %v724_v2  ;;  %p1181_p13 = pneg %p1180_p12 }
  0x23   : > { %v727_v10 = vsel %vm722_vm6, %v724_v2, %v726_v9 }
  0x24   : > { %1107 = vmatpush3.bf16.msra.mxu0 %v1104_v35  ;;  %1083 = vmatpush3.bf16.msra.mxu1 %v1080_v36  ;;  %p1188_p3 = pnand %p1187_p2, %p1181_p13 }
  0x25   : > { %1109 = vmatprep.subr.bf16.mxu0 %v1108_v45  ;;  %1085 = vmatprep.subr.bf16.mxu1 %v1084_v46 }
  0x27   : > { %1011 = vmatmul.mubr.msk.f32.vlgmr.msra.gmra.mrb[0].mxu1 %vm190_vm1, %v1368_v23  ;;  %1044 = vmatmul.mubr.msk.f32.vlgmr.msra.gmra.mrb[0].mxu0 %vm190_vm1, %v543_v55 }
  0x28   : > { %1111 = vmatpush3.bf16.msra.mxu0 %v1108_v45  ;;  %1087 = vmatpush3.bf16.msra.mxu1 %v1084_v46 }
  0x29   : > { %1113 = vmatprep.subr.bf16.mxu0 %v1112_v56  ;;  %1089 = vmatprep.subr.bf16.mxu1 %v1088_v57 }
  0x2a   : > { %1021 = vmatprep.mubr.msk.f32.mxu1 %vm190_vm1, %v357_v60  ;;  %1054 = vmatprep.mubr.msk.f32.mxu0 %vm190_vm1, %v633_v61 }
  0x2c   : > { %1115 = vmatpush3.bf16.msra.mxu0 %v1112_v56  ;;  %1091 = vmatpush3.bf16.msra.mxu1 %v1088_v57 }
  0x2d   : > { %1117 = vmatprep.subr.bf16.mxu0 %v1116_v0 }
  0x2f   : > { %1022 = vmatmul.mubr.msk.f32.vlgmr.msra.gmra.mrb[0].mxu1 %vm190_vm1, %v359_v5  ;;  %1055 = vmatmul.mubr.msk.f32.vlgmr.msra.gmra.mrb[0].mxu0 %vm190_vm1, %v635_v6 }
  0x30   : > { %1119 = vmatpush3.bf16.msra.mxu0 %v1116_v0  ;;  %1065 = vmatprep.mubr.msk.f32.mxu0 %vm190_vm1, %v725_v8 }
  0x31   : > { %1121 = vmatprep.subr.bf16.mxu0 %v1120_v7 }
  0x34   : > { %1123 = vmatpush3.bf16.msra.mxu0 %v1120_v7 }
  0x37   : > { %1066 = vmatmul.mubr.msk.f32.vlgmr.msra.gmra.mrb[0].mxu0 %vm190_vm1, %v727_v10 }
 0x102   : > { %v1023_v11 = vpop.f32.mrb[0].mxu1 }
 0x103   : > { %v430_v12 = vpop.f32.mrb[1].mxu1 }
 0x10a   : > { %v1067_v13 = vpop.f32.mrb[0].mxu0 }
 0x10b   : > { %v1124_v15 = vadd.f32 %v1067_v13, %v1023_v11  ;;  %v798_v16 = vpop.f32.mrb[1].mxu0 }
 0x10c   : > { %v1125_v17 = vadd.f32 %v798_v16, %v430_v12 }
 0x10d   : > { %v817_v18 = vadd.f32 %v1124_v15, %v942_v14 }
 0x10e   : > { %v816_v19 = vadd.f32 %v1125_v17, %v942_v14 }
 0x10f   : > { %v819_v20 = vmax.f32 %v817_v18, 0.0 }
 0x110   : > { %v818_v21 = vmax.f32 %v816_v19, 0.0 }
 0x111   : > { %821 = vst.msk [vmem:[%s163_s9 + $0x8] sm:$0xff] %vm190_vm1, %v819_v20 }
 0x112   : > { %820 = vst.msk [vmem:[%s163_s9] sm:$0xff] %vm190_vm1, %v818_v21 }
 0x113   : > { %1191 = shalt.err (!%p1188_p3)
}
 0x114   : > { %s1192_s27 = scalar_lea.hbm %s1460_s19, 256  ;;  %s1196_s30 = scalar_lea.hbm %s1510_s3, 512 }
 0x115   : > { %p1193_p4 = scmp.ne.s32.totalorder %s1460_s19, %s1192_s27  ;;  %p1197_p9 = scmp.lt.u32.totalorder %s1460_s19, %s1510_s3 }
 0x116   : > { %p1198_p10 = scmp.lt.u32.totalorder %s1196_s30, %s1192_s27  ;;  %p1200_p12 = scmp.lt.u32.totalorder %s1192_s27, %s1460_s19 }
 0x117   : > { %p1194_p7 = pnand %p1193_p4, %p1303_p5 }
 0x118   : > { %p1199_p11 = por %p1198_p10, %p1197_p9 }
 0x119   : > { %p1195_p8 = pneg %p1194_p7 }
 0x11a   : > { %p1201_p13 = por %p1200_p12, %p1199_p11 }
 0x11c   : > { %p1202_p0 = pnand %p1201_p13, %p1195_p8 }
 0x11e   : > { %1205 = shalt.err (!%p1202_p0)
}
 0x11f   : > { %s1243_s6 = smov 128   ;;  %s1244_s7 = smov 8  }
 0x120   : > { %1137 = dma.vmem_to_hbm [thread:$0]  (%p1303_p5), %s1462_s10, 256, %s1460_s19, %s1466_s16, %s1243_s6, %s1243_s6, %s1244_s7  }
 0x121 PF: > { %p1143_p1 = scmp.ge.s32.totalorder %s1240_s15, 2  ;;  %s851_s8 = sand.u32 1, %s1228_s12  }
 0x122   : > { %s852_s9 = scalar_lea.sflag [#allocation3], %s851_s8 }
 0x123   : > { %p1140_p2 = pnand %p1143_p1, %p1307_p6 }
 0x125   : > { %1223 = dma.done.wait (!%p1140_p2), %s852_s9, 256  }
 0x126   : > { %1225 = vsyncadd (!%p1140_p2), %s852_s9, 4294967040  ;;  %p13_p3 = scmp.ge.s32.totalorder %s1290_s18, 4   ;;  %s1513_s12 = smov %s1232_s13 }
 0x127   : > { %s1514_s13 = smov %s1236_s14  ;;  %s1515_s14 = smov %s1301_s21 }
 0x128   : > { %s1516_s15 = smov %s1290_s18  ;;  %15 = sbr.rel (!%p13_p3) target bundleno = 3 (0x3), region = 73 }
 0x12f   :  { %857 = vsyncpa [#allocation3], 1 }
 0x130   :  { %859 = vsyncpa [#allocation3 + $0x1], 1 }

</bundles_post_ra>
